<compile_context>
chip_gen: v5e
topology: v5e:2x2
jax: 0.10.0
libtpu: 0.0.40
codegen_flags: <defaults>
</compile_context>

<pallas_src>
import functools

import jax
import jax.numpy as jnp
from jax.experimental import pallas as pl
from jax.experimental.pallas import tpu as pltpu


def _round_up(v, m):
    return (v + m - 1) // m * m


def _rgcn_kernel(coeff_ref, a_ref, y_ref, invdeg_ref, xdst_ref, loopw_ref,
                 bias_ref, o_ref, *, num_bases, self_loop, use_bias, use_relu):
    """Grid = (dst_tiles ["parallel"], relations ["arbitrary" reduction])."""
    r = pl.program_id(1)

    # ---- init: self-loop matmul doubles as the accumulator init ----------
    @pl.when(r == 0)
    def _():
        if self_loop:
            o_ref[...] = jnp.dot(xdst_ref[...], loopw_ref[...],
                                 preferred_element_type=jnp.float32)
        else:
            o_ref[...] = jnp.zeros_like(o_ref)

    # ---- per relation: recombine basis projections (VPU), one MXU matmul --
    xw = coeff_ref[r, 0] * y_ref[0]                    # coeff scalars live in SMEM
    for b in range(1, num_bases):
        xw = xw + coeff_ref[r, b] * y_ref[b]

    a = a_ref[0]                                       # (TD, Ns) bf16 (binary -> exact)
    msg = jnp.dot(a, xw.astype(jnp.bfloat16),          # bf16 MXU path, f32 accumulate
                  preferred_element_type=jnp.float32)
    o_ref[...] += invdeg_ref[0] * msg                  # right-norm: row scale by 1/deg

    # ---- epilogue: bias + activation --------------------------------------
    @pl.when(r == pl.num_programs(1) - 1)
    def _():
        h = o_ref[...]
        if use_bias:
            h = h + bias_ref[...]
        if use_relu:
            h = jnp.maximum(h, 0.0)
        # TODO(synk): dropout with p > 0 would need pltpu.prng_* sampling; p=0.0 is identity.
        o_ref[...] = h


def rel_graph_conv_layer(adj, x, bases, coeff, loop_weight, h_bias, *,
                         self_loop=True, use_bias=True, use_relu=True,
                         dst_tile=256):
    """adj: (R, N_dst, N_src) f32 binary, x: (N, Fin), bases: (B, Fin, Fout),
    coeff: (R, B), loop_weight: (Fin, Fout), h_bias: (Fout,) -> (N_dst, Fout).
    For the non-basis path pass bases=weight (R,Fin,Fout) and coeff=eye(R)."""
    R, N_dst, N_src = adj.shape
    Fin = x.shape[1]
    B = bases.shape[0]
    Fout = bases.shape[2]

    # ---- lane-dense (>=128) padded geometry --------------------------------
    fin_p = _round_up(Fin, 128)
    fout_p = _round_up(Fout, 128)
    ns_p = _round_up(N_src, 128)
    td = min(dst_tile, _round_up(N_dst, 128))       # dst tile (multiple of 128)
    nd_p = _round_up(N_dst, td)
    n_dst_tiles = nd_p // td

    # ---- one-time hoisted work (outside the relation loop) -----------------
    x_src = jnp.pad(x, ((0, ns_p - N_src), (0, fin_p - Fin)))
    bases_p = jnp.pad(bases, ((0, 0), (0, fin_p - Fin), (0, fout_p - Fout)))
    y = jnp.einsum('sf,bfo->bso', x_src, bases_p)                 # (B, ns_p, fout_p) f32

    a = jnp.pad(adj, ((0, 0), (0, nd_p - N_dst), (0, ns_p - N_src)))
    a = a.astype(jnp.bfloat16)                                    # binary -> exact in bf16

    inv_deg = 1.0 / jnp.maximum(adj.sum(axis=2), 1.0)             # (R, N_dst)
    inv_deg = jnp.pad(inv_deg, ((0, 0), (0, nd_p - N_dst)))[..., None]  # (R, nd_p, 1)

    x_dst = jnp.pad(x, ((0, nd_p - N_dst), (0, fin_p - Fin)))     # src == dst node type here
    loop_w = jnp.pad(loop_weight, ((0, fin_p - Fin), (0, fout_p - Fout)))
    bias2d = jnp.pad(h_bias, (0, fout_p - Fout)).reshape(1, fout_p)

    kernel = functools.partial(_rgcn_kernel, num_bases=B, self_loop=self_loop,
                               use_bias=use_bias, use_relu=use_relu)

    out = pl.pallas_call(
        kernel,
        out_shape=jax.ShapeDtypeStruct((nd_p, fout_p), jnp.float32),
        grid_spec=pltpu.PrefetchScalarGridSpec(
            num_scalar_prefetch=0,
            grid=(n_dst_tiles, R),
            in_specs=[
                pl.BlockSpec(memory_space=pltpu.MemorySpace.SMEM),        # coeff (R, B)
                pl.BlockSpec((1, td, ns_p), lambda d, r: (r, d, 0)),      # A_r dst-tile (bf16)
                pl.BlockSpec((B, ns_p, fout_p), lambda d, r: (0, 0, 0)),  # Y = X @ bases
                pl.BlockSpec((1, td, 1), lambda d, r: (r, d, 0)),         # 1/clamp(deg,1)
                pl.BlockSpec((td, fin_p), lambda d, r: (d, 0)),           # X_dst tile
                pl.BlockSpec((fin_p, fout_p), lambda d, r: (0, 0)),       # loop weight
                pl.BlockSpec((1, fout_p), lambda d, r: (0, 0)),           # bias
            ],
            out_specs=pl.BlockSpec((td, fout_p), lambda d, r: (d, 0)),
        ),
        compiler_params=pltpu.CompilerParams(
            dimension_semantics=("parallel", "arbitrary"),
            vmem_limit_bytes=64 * 1024 * 1024),
    )(coeff, a, y, inv_deg, x_dst, loop_w, bias2d)

    return out[:N_dst, :Fout]


def _xavier_uniform(key, shape, gain):
    fan_in, fan_out = shape[-2], shape[-1]
    bound = gain * (6.0 / (fan_in + fan_out)) ** 0.5
    return jax.random.uniform(key, shape, jnp.float32, -bound, bound)


def _reference(adj, x, bases, coeff, loop_weight, h_bias):
    weight = jnp.einsum('rb,bio->rio', coeff, bases)              # (R, Fin, Fout)
    deg = jnp.maximum(adj.sum(axis=2), 1.0)                       # (R, N)
    msgs = jnp.einsum('rds,sf->rdf', adj, x) / deg[..., None]     # (R, N, Fin)
    h = jnp.einsum('rdf,rfo->do', msgs, weight)                   # (N, Fout)
    h = h + x @ loop_weight + h_bias
    return jax.nn.relu(h)


if __name__ == "__main__":
    # small deterministic config
    N = 64          # nodes (single node type; src == dst)
    IN_FEAT = 32
    OUT_FEAT = 32
    REL_NAMES = ["r0", "r1", "r2"]
    NUM_BASES = 2   # < num relations -> basis decomposition path
    R = len(REL_NAMES)
    gain = 2.0 ** 0.5  # calculate_gain('relu')

    key = jax.random.PRNGKey(0)
    k_adj, k_x, k_bases, k_coeff, k_loop = jax.random.split(key, 5)

    # dense binary adjacency per relation (dst x src)
    adj = jax.random.bernoulli(k_adj, 0.15, (R, N, N)).astype(jnp.float32)
    x = jax.random.normal(k_x, (N, IN_FEAT), jnp.float32)

    # WeightBasis: bases (B, Fin, Fout), coefficients (R, B); W_r = sum_b coeff[r,b]*base_b
    bases = _xavier_uniform(k_bases, (NUM_BASES, IN_FEAT, OUT_FEAT), gain)
    coeff = _xavier_uniform(k_coeff, (R, NUM_BASES), gain)

    loop_weight = _xavier_uniform(k_loop, (IN_FEAT, OUT_FEAT), gain)
    h_bias = jnp.zeros((OUT_FEAT,), jnp.float32)                  # nn.init.zeros_

    out = rel_graph_conv_layer(adj, x, bases, coeff, loop_weight, h_bias,
                               self_loop=True, use_bias=True, use_relu=True)
    out = jax.block_until_ready(out)

    ref = _reference(adj, x, bases, coeff, loop_weight, h_bias)
    assert out.shape == (N, OUT_FEAT)
    # tolerance loosened slightly: the message matmul runs on the bf16 MXU path
    # (adjacency is exact in bf16, the recombined X@W tile is rounded to bf16).
    err = float(jnp.max(jnp.abs(out - ref)))
    assert jnp.allclose(out, ref, atol=2e-2, rtol=2e-2), err

    print("KERNEL_OK")
</pallas_src>

<mosaic_0001>
module attributes {stable_mosaic.version = 11 : i64} {
  func.func @_rgcn_kernel(%arg0: i32, %arg1: i32, %arg2: memref<3x2xf32, #tpu.memory_space<smem>>, %arg3: memref<1x128x128xbf16, #tpu.memory_space<vmem>>, %arg4: memref<2x128x128xf32, #tpu.memory_space<vmem>>, %arg5: memref<1x128x1xf32, #tpu.memory_space<vmem>>, %arg6: memref<128x128xf32, #tpu.memory_space<vmem>>, %arg7: memref<128x128xf32, #tpu.memory_space<vmem>>, %arg8: memref<1x128xf32, #tpu.memory_space<vmem>>, %arg9: memref<128x128xf32, #tpu.memory_space<vmem>>) attributes {dimension_semantics = [#tpu.dimension_semantics<parallel>, #tpu.dimension_semantics<arbitrary>], iteration_bounds = array<i64: 1, 3>, scalar_prefetch = 0 : i64, scratch_operands = 0 : i64, tpu.core_type = #tpu.core_type<tc>, window_params = [{transform_indices = @transform_0, window_bounds = array<i64: 3, 2>}, {transform_indices = @transform_1, window_bounds = array<i64: 1, 128, 128>}, {pipeline_mode = #tpu.pipeline_mode<synchronous>, transform_indices = @transform_2, window_bounds = array<i64: 2, 128, 128>}, {transform_indices = @transform_3, window_bounds = array<i64: 1, 128, 1>}, {transform_indices = @transform_4, window_bounds = array<i64: 128, 128>}, {pipeline_mode = #tpu.pipeline_mode<synchronous>, transform_indices = @transform_5, window_bounds = array<i64: 128, 128>}, {pipeline_mode = #tpu.pipeline_mode<synchronous>, transform_indices = @transform_6, window_bounds = array<i64: 1, 128>}, {transform_indices = @transform_7, window_bounds = array<i64: 128, 128>}]} {
    %c0_i32 = arith.constant 0 : i32
    %0 = arith.cmpi eq, %arg1, %c0_i32 : i32
    %1 = arith.extui %0 : i1 to i32
    %c0_i32_0 = arith.constant 0 : i32
    %2 = arith.cmpi ne, %1, %c0_i32_0 : i32
    scf.if %2 {
      %c0_18 = arith.constant 0 : index
      %c0_19 = arith.constant 0 : index
      %30 = vector.load %arg6[%c0_18, %c0_19] : memref<128x128xf32, #tpu.memory_space<vmem>>, vector<128x128xf32>
      %c0_20 = arith.constant 0 : index
      %c0_21 = arith.constant 0 : index
      %31 = vector.load %arg7[%c0_20, %c0_21] : memref<128x128xf32, #tpu.memory_space<vmem>>, vector<128x128xf32>
      %cst_22 = arith.constant dense<0.000000e+00> : vector<128x128xf32>
      %32 = tpu.matmul %30, %31, %cst_22 {dimension_numbers = #tpu.dot_dimension_numbers<[1], [0], [0], [1], [0, 0, 1, 1], [], []>} : vector<128x128xf32>, vector<128x128xf32>, vector<128x128xf32> -> vector<128x128xf32>
      %c0_23 = arith.constant 0 : index
      %c0_24 = arith.constant 0 : index
      %33 = vector.load %arg9[%c0_23, %c0_24] : memref<128x128xf32, #tpu.memory_space<vmem>>, vector<128x128xf32>
      tpu.vector_store %arg9[%c0_23, %c0_24], %32 {strides = array<i32>} : memref<128x128xf32, #tpu.memory_space<vmem>>, vector<128x128xf32>,
    } else {
    }
    %3 = arith.index_cast %arg1 : i32 to index
    %c0 = arith.constant 0 : index
    %4 = memref.load %arg2[%3, %c0] : memref<3x2xf32, #tpu.memory_space<smem>>
    %c0_1 = arith.constant 0 : index
    %c0_2 = arith.constant 0 : index
    %c0_3 = arith.constant 0 : index
    %5 = vector.load %arg4[%c0_1, %c0_2, %c0_3] : memref<2x128x128xf32, #tpu.memory_space<vmem>>, vector<1x128x128xf32>
    %6 = vector.shape_cast %5 : vector<1x128x128xf32> to vector<128x128xf32>
    %7 = vector.broadcast %4 : f32 to vector<128x128xf32>
    %8 = arith.mulf %7, %6 : vector<128x128xf32>
    %9 = arith.index_cast %arg1 : i32 to index
    %c1 = arith.constant 1 : index
    %10 = memref.load %arg2[%9, %c1] : memref<3x2xf32, #tpu.memory_space<smem>>
    %c1_4 = arith.constant 1 : index
    %c0_5 = arith.constant 0 : index
    %c0_6 = arith.constant 0 : index
    %11 = vector.load %arg4[%c1_4, %c0_5, %c0_6] : memref<2x128x128xf32, #tpu.memory_space<vmem>>, vector<1x128x128xf32>
    %12 = vector.shape_cast %11 : vector<1x128x128xf32> to vector<128x128xf32>
    %13 = vector.broadcast %10 : f32 to vector<128x128xf32>
    %14 = arith.mulf %13, %12 : vector<128x128xf32>
    %15 = arith.addf %8, %14 : vector<128x128xf32>
    %c0_7 = arith.constant 0 : index
    %c0_8 = arith.constant 0 : index
    %c0_9 = arith.constant 0 : index
    %16 = vector.load %arg3[%c0_7, %c0_8, %c0_9] : memref<1x128x128xbf16, #tpu.memory_space<vmem>>, vector<1x128x128xbf16>
    %17 = vector.shape_cast %16 : vector<1x128x128xbf16> to vector<128x128xbf16>
    %18 = arith.truncf %15 : vector<128x128xf32> to vector<128x128xbf16>
    %cst = arith.constant dense<0.000000e+00> : vector<128x128xf32>
    %19 = tpu.matmul %17, %18, %cst {dimension_numbers = #tpu.dot_dimension_numbers<[1], [0], [0], [1], [0, 0, 1, 1], [], []>} : vector<128x128xbf16>, vector<128x128xbf16>, vector<128x128xf32> -> vector<128x128xf32>
    %c0_10 = arith.constant 0 : index
    %c0_11 = arith.constant 0 : index
    %20 = vector.load %arg9[%c0_10, %c0_11] : memref<128x128xf32, #tpu.memory_space<vmem>>, vector<128x128xf32>
    %c0_12 = arith.constant 0 : index
    %c0_13 = arith.constant 0 : index
    %c0_14 = arith.constant 0 : index
    %21 = vector.load %arg5[%c0_12, %c0_13, %c0_14] : memref<1x128x1xf32, #tpu.memory_space<vmem>>, vector<1x128x1xf32>
    %22 = vector.shape_cast %21 : vector<1x128x1xf32> to vector<128x1xf32>
    %23 = vector.broadcast %22 : vector<128x1xf32> to vector<128x128xf32>
    %24 = arith.mulf %23, %19 : vector<128x128xf32>
    %25 = arith.addf %20, %24 : vector<128x128xf32>
    %c0_15 = arith.constant 0 : index
    %c0_16 = arith.constant 0 : index
    %26 = vector.load %arg9[%c0_15, %c0_16] : memref<128x128xf32, #tpu.memory_space<vmem>>, vector<128x128xf32>
    tpu.vector_store %arg9[%c0_15, %c0_16], %25 {strides = array<i32>} : memref<128x128xf32, #tpu.memory_space<vmem>>, vector<128x128xf32>,
    %c2_i32 = arith.constant 2 : i32
    %27 = arith.cmpi eq, %arg1, %c2_i32 : i32
    %28 = arith.extui %27 : i1 to i32
    %c0_i32_17 = arith.constant 0 : i32
    %29 = arith.cmpi ne, %28, %c0_i32_17 : i32
    scf.if %29 {
      %c0_18 = arith.constant 0 : index
      %c0_19 = arith.constant 0 : index
      %30 = vector.load %arg9[%c0_18, %c0_19] : memref<128x128xf32, #tpu.memory_space<vmem>>, vector<128x128xf32>
      %c0_20 = arith.constant 0 : index
      %c0_21 = arith.constant 0 : index
      %31 = vector.load %arg8[%c0_20, %c0_21] : memref<1x128xf32, #tpu.memory_space<vmem>>, vector<1x128xf32>
      %32 = vector.broadcast %31 : vector<1x128xf32> to vector<128x128xf32>
      %33 = arith.addf %30, %32 : vector<128x128xf32>
      %cst_22 = arith.constant 0.000000e+00 : f32
      %34 = vector.broadcast %cst_22 : f32 to vector<128x128xf32>
      %35 = arith.maximumf %33, %34 : vector<128x128xf32>
      %c0_23 = arith.constant 0 : index
      %c0_24 = arith.constant 0 : index
      %36 = vector.load %arg9[%c0_23, %c0_24] : memref<128x128xf32, #tpu.memory_space<vmem>>, vector<128x128xf32>
      tpu.vector_store %arg9[%c0_23, %c0_24], %35 {strides = array<i32>} : memref<128x128xf32, #tpu.memory_space<vmem>>, vector<128x128xf32>,
    } else {
    }
    return
  }
  func.func @transform_0(%arg0: i32, %arg1: i32) -> (i32, i32) {
    %c0_i32 = arith.constant 0 : i32
    %c0_i32_0 = arith.constant 0 : i32
    %c0_i32_1 = arith.constant 0 : i32
    return %c0_i32, %c0_i32_0 : i32, i32
  }
  func.func @transform_1(%arg0: i32, %arg1: i32) -> (i32, i32, i32) {
    %c0_i32 = arith.constant 0 : i32
    %c0_i32_0 = arith.constant 0 : i32
    return %arg1, %arg0, %c0_i32 : i32, i32, i32
  }
  func.func @transform_2(%arg0: i32, %arg1: i32) -> (i32, i32, i32) {
    %c0_i32 = arith.constant 0 : i32
    %c0_i32_0 = arith.constant 0 : i32
    %c0_i32_1 = arith.constant 0 : i32
    %c0_i32_2 = arith.constant 0 : i32
    return %c0_i32, %c0_i32_0, %c0_i32_1 : i32, i32, i32
  }
  func.func @transform_3(%arg0: i32, %arg1: i32) -> (i32, i32, i32) {
    %c0_i32 = arith.constant 0 : i32
    %c0_i32_0 = arith.constant 0 : i32
    return %arg1, %arg0, %c0_i32 : i32, i32, i32
  }
  func.func @transform_4(%arg0: i32, %arg1: i32) -> (i32, i32) {
    %c0_i32 = arith.constant 0 : i32
    %c0_i32_0 = arith.constant 0 : i32
    return %arg0, %c0_i32 : i32, i32
  }
  func.func @transform_5(%arg0: i32, %arg1: i32) -> (i32, i32) {
    %c0_i32 = arith.constant 0 : i32
    %c0_i32_0 = arith.constant 0 : i32
    %c0_i32_1 = arith.constant 0 : i32
    return %c0_i32, %c0_i32_0 : i32, i32
  }
  func.func @transform_6(%arg0: i32, %arg1: i32) -> (i32, i32) {
    %c0_i32 = arith.constant 0 : i32
    %c0_i32_0 = arith.constant 0 : i32
    %c0_i32_1 = arith.constant 0 : i32
    return %c0_i32, %c0_i32_0 : i32, i32
  }
  func.func @transform_7(%arg0: i32, %arg1: i32) -> (i32, i32) {
    %c0_i32 = arith.constant 0 : i32
    %c0_i32_0 = arith.constant 0 : i32
    return %arg0, %c0_i32 : i32, i32
  }
}

</mosaic_0001>

<bundles_post_ra>
// kernel: tpu_custom_call.1
= control target key start
LH: loop header
LB: loop body
LE: loop exit
PB: predicated region body
PF: predicated region fallthrough
CT: control target
= control target key end

     0   :  { %s1899_s0 = inlined_call_operand.vmem [shape: f32[3,2], index: 0, kind: input, shape index: {}]   ;;  %s1900_s1 = inlined_call_operand.hbm [shape: bf16[3,128,128], index: 1, kind: input, shape index: {}]   ;;  %s1901_s2 = inlined_call_operand.vmem [shape: f32[2,128,128], index: 2, kind: input, shape index: {}]   ;;  %s1902_s3 = inlined_call_operand.vmem [shape: f32[3,128,1], index: 3, kind: input, shape index: {}]   ;;  %s1903_s4 = inlined_call_operand.vmem [shape: f32[128,128], index: 4, kind: input, shape index: {}]   ;;  %s1904_s5 = inlined_call_operand.hbm [shape: f32[128,128], index: 5, kind: input, shape index: {}]   ;;  %s1905_s6 = inlined_call_operand.vmem [shape: f32[1,128], index: 6, kind: input, shape index: {}]   ;;  %s1906_s7 = inlined_call_operand.hbm [shape: f32[128,128], index: 7, kind: output, shape index: {}]  }
   0x1   :  { %1908 = sst [smem:[#allocation14_spill]] %s1899_s0 }
   0x2   :  { %1909 = sst [smem:[#allocation15_spill]] %s1904_s5 }
   0x3   :  { %12 = vsyncpa [#allocation5], 0 }
   0x4   :  { %13 = vsyncpa [#allocation3], 0 }
   0x5   :  { %15 = vsyncpa [#allocation3 + $0x1], 0 }
   0x6   :  { %16 = vsyncpa [#allocation8], 0 }
   0x7   :  { %17 = vsyncpa [#allocation4], 0  ;;  %s1552_s24 = smov 0   ;;  %s1554_s25 = smov 0  }
   0x8   :  { %s1556_s26 = smov 0   ;;  %s1558_s27 = smov 0  }
   0x9   :  { %s1560_s28 = smov 0   ;;  %s1562_s29 = smov 0  }
   0xa LB: > { %s1907_s30 = sadd.s32 4294967295, %s1500_s29   ;;  %p72_p0 = scmp.ne.s32.totalorder %s1488_s26, %s1484_s25  ;;  %s1500_s29 = sphi %s1562_s29, %s23_s29   ;;  %s1496_s28 = sphi %s1560_s28, %s1922_s28   ;;  %s1492_s27 = sphi %s1558_s27, %s1921_s27   ;;  %s1488_s26 = sphi %s1556_s26, %s1920_s26   ;;  %s1484_s25 = sphi %s1554_s25, %s1919_s25   ;;  %s1480_s24 = sphi %s1552_s24, %s1918_s24  }
   0xb   : > { %p73_p1 = scmp.eq.s32.totalorder %s1500_s29, 0  ;;  %p78_p2 = scmp.ne.s32.totalorder %s1484_s25, %s1480_s24 }
   0xc   : > { %p1588_p3 = scmp.eq.s32.totalorder %s1907_s30, 0  ;;  %p1090_p5 = scmp.ge.s32.totalorder %s1500_s29, 1 }
   0xd   : > { %p74_p4 = por %p73_p1, %p72_p0  ;;  %p232_p7 = scmp.lt.s32.totalorder %s1500_s29, 4 }
   0xe   : > { %p1595_p6 = por %p1588_p3, %p78_p2  ;;  %s1912_s0 = sld [smem:[#allocation14_spill]] }
   0xf   : > { %p1603_p8 = pnand %p1090_p5, %p232_p7  ;;  %p1268_p10 = scmp.lt.s32.totalorder %s1500_s29, 3 }
  0x10   : > { %s1914_s5 = sld [smem:[#allocation15_spill]]  ;;  %s1502_s19 = smov [#allocation7]  }
  0x11   : > { %p1255_p9 = pneg %p1603_p8  ;;  %p1615_p12 = pnand %p1268_p10, %p74_p4 }
  0x12   : > { %s267_s20 = sshll.u32 %s1502_s19, 4  ;;  %s1503_s21 = smov [#allocation2]   ;;  %s268_s20 = int_to_ptr.vmem [resolvable:$true] %s267_s20 }
  0x13   : > { %p1256_p11 = pnand %p1255_p9, %p1588_p3  ;;  %s1504_s22 = smov 128  }
  0x14   : > { %s244_s13 = sshll.u32 %s1912_s0, 4  ;;  %s1505_s23 = smov 8   ;;  %s245_s13 = int_to_ptr.vmem [resolvable:$true] %s244_s13 }
  0x15   : > { %1258 = dma.vmem_to_smem (!%p1256_p11), %s245_s13, 64, %s1503_s21, [#allocation5]  }
  0x16   : > { %s265_s17 = sshll.u32 %s1914_s5, 4  ;;  %s284_s24 = sand.u32 1, %s1488_s26   ;;  %s266_s17 = int_to_ptr.hbm [resolvable:$true] %s265_s17 }
  0x17   : > { %1261 = dma.hbm_to_vmem [thread:$0]  (!%p1256_p11), %s266_s17, 2048, %s268_s20, [#allocation8], %s1504_s22, %s1504_s22, %s1505_s23  }
  0x18   : > { %s32_s11 = sadd.s32 1, %s1496_s28  ;;  %s1095_s12 = sshll.u32 %s284_s24, 6 }
  0x19   : > { %p33_p13 = scmp.ge.s32.totalorder %s32_s11, 3  ;;  %s1159_s15 = sshll.u32 %s1496_s28, 6 }
  0x1a   : > { %s295_s19 = scalar_lea.hbm %s1900_s1, %s1159_s15  ;;  %s288_s13 = scalar_lea.vmem [#allocation6], %s1095_s12 }
  0x1b   : > { %s1924_s11 = smov (%p33_p13, %s32_s11), 0  ;;  %s298_s21 = sshll.u32 %s288_s13, 4  ;;  %s299_s21 = int_to_ptr.vmem [resolvable:$true] %s298_s21 }
  0x1c   : > { %s60_s8 = ssub.s32 %s1496_s28, %s1924_s11  ;;  %s296_s0 = sshll.u32 %s295_s19, 4  ;;  %s297_s0 = int_to_ptr.hbm [resolvable:$true] %s296_s0 }
  0x1d   : > { %p63_p0 = scmp.eq.s32.totalorder %s60_s8, 0  ;;  %s1916_s17 = sadd.s32 1, %s1488_s26 }
  0x1e   : > { %s285_s22 = scalar_lea.sflag [#allocation3], %s284_s24  ;;  %s1506_s23 = smov 64  }
  0x1f   : > { %s1632_s20 = scalar_select %p63_p0, %s1488_s26, %s1916_s17  }
  0x20   : > { %s1507_s5 = smov 4   ;;  %323 = sbr.rel (%p1603_p8) target bundleno = 482 (0x1e2), region = 48 }
  0x21   : > { %1265 = dma.hbm_to_vmem [thread:$0]  (!%p1615_p12), %s297_s0, 1024, %s299_s21, %s285_s22, %s1506_s23, %s1506_s23, %s1507_s5  }
  0x25   : > { %1463 = dma.done.wait (%p1588_p3), [#allocation5], 64  }
  0x26   : > { %1465 = vsyncadd (%p1588_p3), [#allocation5], 4294967232  ;;  %s330_s30 = sand.u32 1, %s1484_s25  }
  0x27   : > { %s1100_s8 = sshll.u32 %s330_s30, 6  ;;  %s331_s12 = scalar_lea.sflag [#allocation3], %s330_s30 }
  0x28   : > { %s1643_s15 = scalar_lea.vmem [#allocation6], %s1100_s8 }
  0x29   : > { %1467 = dma.done.wait (%p1595_p6), %s331_s12, 1024  }
  0x2a   : > { %1469 = vsyncadd (%p1595_p6), %s331_s12, 4294966272 }
  0x2b   : > { %1471 = dma.done.wait (%p1588_p3), [#allocation8], 2048  }
  0x2c   : > { %1473 = vsyncadd (%p1588_p3), [#allocation8], 4294965248 }
  0x2d   : > { %345 = sfence }
  0x2e   : > { %p383_p1 = scmp.lt.s32.totalorder %s1492_s27, 2  ;;  %p1104_p2 = scmp.ne.s32.totalorder %s1492_s27, 0 }
  0x30   : > { %s384_s0 = scalar_select %p383_p1, %s1492_s27, 2 }
  0x31   : > { %402 = sbr.rel (%p1104_p2) target bundleno = 244 (0xf4), region = 64 }
  0x32   : > { %s1160_s5 = sshll.u32 %s384_s0, 7 }
  0x33   : > { %s1658_s24 = scalar_lea.vmem %s1902_s3, %s1160_s5 }
  0x36   : > { %v434_v0 = vld [vmem:[#allocation7 + $0x78] sm:$0xff]  ;;  %v433_v1 = vld [vmem:[#allocation7 + $0x70] sm:$0xff]  ;;  %v432_v2 = vld [vmem:[#allocation7 + $0x68] sm:$0xff] }
  0x37   : > { %1170 = vmatpush.msra.mxu2 %v434_v0  ;;  %1171 = vmatpush.msra.mxu3 %v434_v0  ;;  %v431_v3 = vld [vmem:[#allocation7 + $0x60] sm:$0xff]  ;;  %v430_v4 = vld [vmem:[#allocation7 + $0x58] sm:$0xff]  ;;  %v429_v5 = vld [vmem:[#allocation7 + $0x50] sm:$0xff] }
  0x38   : > { %435 = vmatpush.msra.mxu0 %v434_v0  ;;  %1169 = vmatpush.msra.mxu1 %v434_v0  ;;  %v428_v6 = vld [vmem:[#allocation7 + $0x48] sm:$0xff]  ;;  %v427_v7 = vld [vmem:[#allocation7 + $0x40] sm:$0xff]  ;;  %v426_v8 = vld [vmem:[#allocation7 + $0x38] sm:$0xff] }
  0x39   : > { %1173 = vmatpush.msra.mxu2 %v433_v1  ;;  %1174 = vmatpush.msra.mxu3 %v433_v1  ;;  %v425_v9 = vld [vmem:[#allocation7 + $0x30] sm:$0xff]  ;;  %v424_v10 = vld [vmem:[#allocation7 + $0x28] sm:$0xff]  ;;  %v423_v11 = vld [vmem:[#allocation7 + $0x20] sm:$0xff] }
  0x3a   : > { %436 = vmatpush.msra.mxu0 %v433_v1  ;;  %1172 = vmatpush.msra.mxu1 %v433_v1  ;;  %v422_v12 = vld [vmem:[#allocation7 + $0x18] sm:$0xff]  ;;  %v421_v13 = vld [vmem:[#allocation7 + $0x10] sm:$0xff]  ;;  %v420_v14 = vld [vmem:[#allocation7 + $0x8] sm:$0xff] }
  0x3b   : > { %1176 = vmatpush.msra.mxu2 %v432_v2  ;;  %1177 = vmatpush.msra.mxu3 %v432_v2  ;;  %v419_v15 = vld [vmem:[#allocation7] sm:$0xff]  ;;  %v412_v20 = vld [vmem:[%s1903_s4 + $0x48] sm:$0xff]  ;;  %v413_v24 = vld [vmem:[%s1903_s4 + $0x50] sm:$0xff] }
  0x3c   : > { %437 = vmatpush.msra.mxu0 %v432_v2  ;;  %1175 = vmatpush.msra.mxu1 %v432_v2  ;;  %v411_v16 = vld [vmem:[%s1903_s4 + $0x40] sm:$0xff]  ;;  %v416_v21 = vld [vmem:[%s1903_s4 + $0x68] sm:$0xff]  ;;  %v417_v25 = vld [vmem:[%s1903_s4 + $0x70] sm:$0xff] }
  0x3d   : > { %1179 = vmatpush.msra.mxu2 %v431_v3  ;;  %1180 = vmatpush.msra.mxu3 %v431_v3  ;;  %v415_v17 = vld [vmem:[%s1903_s4 + $0x60] sm:$0xff]  ;;  %v404_v22 = vld [vmem:[%s1903_s4 + $0x8] sm:$0xff]  ;;  %v405_v26 = vld [vmem:[%s1903_s4 + $0x10] sm:$0xff] }
  0x3e   : > { %438 = vmatpush.msra.mxu0 %v431_v3  ;;  %1178 = vmatpush.msra.mxu1 %v431_v3  ;;  %v403_v18 = vld [vmem:[%s1903_s4] sm:$0xff]  ;;  %v408_v23 = vld [vmem:[%s1903_s4 + $0x28] sm:$0xff]  ;;  %v409_v27 = vld [vmem:[%s1903_s4 + $0x30] sm:$0xff] }
  0x3f   : > { %1182 = vmatpush.msra.mxu2 %v430_v4  ;;  %1183 = vmatpush.msra.mxu3 %v430_v4  ;;  %v407_v19 = vld [vmem:[%s1903_s4 + $0x20] sm:$0xff]  ;;  %v414_v28 = vld [vmem:[%s1903_s4 + $0x58] sm:$0xff] }
  0x40   : > { %439 = vmatpush.msra.mxu0 %v430_v4  ;;  %1181 = vmatpush.msra.mxu1 %v430_v4  ;;  %v418_v29 = vld [vmem:[%s1903_s4 + $0x78] sm:$0xff] }
  0x41   : > { %1185 = vmatpush.msra.mxu2 %v429_v5  ;;  %1186 = vmatpush.msra.mxu3 %v429_v5  ;;  %v406_v30 = vld [vmem:[%s1903_s4 + $0x18] sm:$0xff] }
  0x42   : > { %440 = vmatpush.msra.mxu0 %v429_v5  ;;  %1184 = vmatpush.msra.mxu1 %v429_v5  ;;  %v410_v31 = vld [vmem:[%s1903_s4 + $0x38] sm:$0xff] }
  0x43   : > { %1188 = vmatpush.msra.mxu2 %v428_v6  ;;  %1189 = vmatpush.msra.mxu3 %v428_v6 }
  0x44   : > { %441 = vmatpush.msra.mxu0 %v428_v6  ;;  %1187 = vmatpush.msra.mxu1 %v428_v6 }
  0x45   : > { %1191 = vmatpush.msra.mxu2 %v427_v7  ;;  %1192 = vmatpush.msra.mxu3 %v427_v7 }
  0x46   : > { %442 = vmatpush.msra.mxu0 %v427_v7  ;;  %1190 = vmatpush.msra.mxu1 %v427_v7 }
  0x47   : > { %1194 = vmatpush.msra.mxu2 %v426_v8  ;;  %1195 = vmatpush.msra.mxu3 %v426_v8 }
  0x48   : > { %443 = vmatpush.msra.mxu0 %v426_v8  ;;  %1193 = vmatpush.msra.mxu1 %v426_v8 }
  0x49   : > { %1197 = vmatpush.msra.mxu2 %v425_v9  ;;  %1198 = vmatpush.msra.mxu3 %v425_v9 }
  0x4a   : > { %444 = vmatpush.msra.mxu0 %v425_v9  ;;  %1196 = vmatpush.msra.mxu1 %v425_v9 }
  0x4b   : > { %1200 = vmatpush.msra.mxu2 %v424_v10  ;;  %1201 = vmatpush.msra.mxu3 %v424_v10 }
  0x4c   : > { %445 = vmatpush.msra.mxu0 %v424_v10  ;;  %1199 = vmatpush.msra.mxu1 %v424_v10 }
  0x4d   : > { %1203 = vmatpush.msra.mxu2 %v423_v11  ;;  %1204 = vmatpush.msra.mxu3 %v423_v11 }
  0x4e   : > { %446 = vmatpush.msra.mxu0 %v423_v11  ;;  %1202 = vmatpush.msra.mxu1 %v423_v11 }
  0x4f   : > { %1206 = vmatpush.msra.mxu2 %v422_v12  ;;  %1207 = vmatpush.msra.mxu3 %v422_v12 }
  0x50   : > { %447 = vmatpush.msra.mxu0 %v422_v12  ;;  %1205 = vmatpush.msra.mxu1 %v422_v12 }
  0x51   : > { %1209 = vmatpush.msra.mxu2 %v421_v13  ;;  %1210 = vmatpush.msra.mxu3 %v421_v13 }
  0x52   : > { %448 = vmatpush.msra.mxu0 %v421_v13  ;;  %1208 = vmatpush.msra.mxu1 %v421_v13 }
  0x53   : > { %1212 = vmatpush.msra.mxu2 %v420_v14  ;;  %1213 = vmatpush.msra.mxu3 %v420_v14 }
  0x54   : > { %449 = vmatpush.msra.mxu0 %v420_v14  ;;  %1211 = vmatpush.msra.mxu1 %v420_v14 }
  0x55   : > { %1215 = vmatpush.msra.mxu2 %v419_v15  ;;  %1216 = vmatpush.msra.mxu3 %v419_v15 }
  0x56   : > { %475 = vmatmul.f32.vlgmr.msra.gmra.mxu2 %v411_v16  ;;  %487 = vmatmul.f32.vlgmr.msra.gmra.mxu3 %v415_v17 }
  0x57   : > { %450 = vmatpush.msra.mxu0 %v419_v15  ;;  %1214 = vmatpush.msra.mxu1 %v419_v15 }
  0x58   : > { %451 = vmatmul.f32.vlgmr.msra.gmra.mxu0 %v403_v18  ;;  %463 = vmatmul.f32.vlgmr.msra.gmra.mxu1 %v407_v19 }
  0x5e   : > { %478 = vmatmul.f32.gmra.mxu2 %v412_v20  ;;  %490 = vmatmul.f32.gmra.mxu3 %v416_v21 }
  0x60   : > { %454 = vmatmul.f32.gmra.mxu0 %v404_v22  ;;  %466 = vmatmul.f32.gmra.mxu1 %v408_v23 }
  0x66   : > { %481 = vmatmul.f32.gmra.mxu2 %v413_v24  ;;  %493 = vmatmul.f32.gmra.mxu3 %v417_v25 }
  0x68   : > { %457 = vmatmul.f32.gmra.mxu0 %v405_v26  ;;  %469 = vmatmul.f32.gmra.mxu1 %v409_v27 }
  0x6e   : > { %484 = vmatmul.f32.gmra.mxu2 %v414_v28  ;;  %496 = vmatmul.f32.gmra.mxu3 %v418_v29 }
  0x70   : > { %460 = vmatmul.f32.gmra.mxu0 %v406_v30  ;;  %472 = vmatmul.f32.gmra.mxu1 %v410_v31 }
  0xd5   : > { %v452_v32 = vpop.f32.mrf.mxu0  ;;  %v464_v33 = vpop.f32.mrf.mxu1 }
  0xd6   : > { %500 = vst [vmem:[#allocation9] sm:$0xff] %v452_v32 }
  0xd7   : > { %504 = vst [vmem:[#allocation9 + $0x20] sm:$0xff] %v464_v33 }
  0xd9   : > { %v476_v34 = vpop.f32.mrf.mxu2  ;;  %v488_v35 = vpop.f32.mrf.mxu3 }
  0xda   : > { %508 = vst [vmem:[#allocation9 + $0x40] sm:$0xff] %v476_v34 }
  0xdb   : > { %512 = vst [vmem:[#allocation9 + $0x60] sm:$0xff] %v488_v35 }
  0xdd   : > { %v455_v36 = vpop.f32.mrf.mxu0  ;;  %v467_v37 = vpop.f32.mrf.mxu1 }
  0xde   : > { %501 = vst [vmem:[#allocation9 + $0x8] sm:$0xff] %v455_v36 }
  0xdf   : > { %505 = vst [vmem:[#allocation9 + $0x28] sm:$0xff] %v467_v37 }
  0xe1   : > { %v479_v38 = vpop.f32.mrf.mxu2  ;;  %v491_v39 = vpop.f32.mrf.mxu3 }
  0xe2   : > { %509 = vst [vmem:[#allocation9 + $0x48] sm:$0xff] %v479_v38 }
  0xe3   : > { %513 = vst [vmem:[#allocation9 + $0x68] sm:$0xff] %v491_v39 }
  0xe5   : > { %v458_v40 = vpop.f32.mrf.mxu0  ;;  %v470_v41 = vpop.f32.mrf.mxu1 }
  0xe6   : > { %502 = vst [vmem:[#allocation9 + $0x10] sm:$0xff] %v458_v40 }
  0xe7   : > { %506 = vst [vmem:[#allocation9 + $0x30] sm:$0xff] %v470_v41 }
  0xe9   : > { %v482_v42 = vpop.f32.mrf.mxu2  ;;  %v494_v43 = vpop.f32.mrf.mxu3 }
  0xea   : > { %510 = vst [vmem:[#allocation9 + $0x50] sm:$0xff] %v482_v42 }
  0xeb   : > { %514 = vst [vmem:[#allocation9 + $0x70] sm:$0xff] %v494_v43 }
  0xed   : > { %v461_v44 = vpop.f32.mrf.mxu0  ;;  %v473_v45 = vpop.f32.mrf.mxu1 }
  0xee   : > { %503 = vst [vmem:[#allocation9 + $0x18] sm:$0xff] %v461_v44 }
  0xef   : > { %507 = vst [vmem:[#allocation9 + $0x38] sm:$0xff] %v473_v45 }
  0xf1   : > { %v485_v46 = vpop.f32.mrf.mxu2  ;;  %v497_v47 = vpop.f32.mrf.mxu3 }
  0xf2   : > { %511 = vst [vmem:[#allocation9 + $0x58] sm:$0xff] %v485_v46 }
  0xf3   : > { %515 = vst [vmem:[#allocation9 + $0x78] sm:$0xff] %v497_v47 }
  0xf4 PF: > { %v740_v48 = vld [vmem:[%s1658_s24] sm:$0xff]  ;;  %s1105_s9 = sshll.u32 %s1492_s27, 7  ;;  %v1508_v49 = vmov 0   ;;  %v742_v50 = vld [vmem:[%s1658_s24 + $0x10] sm:$0xff]  ;;  %v533_v52 = vld [vmem:[%s1901_s2 + $0x78] sm:$0xff]  ;;  %p1154_p3 = scmp.ne.s32.totalorder %s1492_s27, 2 }
  0xf5   : > { %1331 = vset.pattern.permute.xlu0 %v1508_v49  ;;  %s517_s10 = sld [smem:[#allocation2 + %s1105_s9]]  ;;  %s551_s16 = sadd.s32 1, %s1105_s9  ;;  %1332 = vset.pattern.permute.xlu1 %v1508_v49  ;;  %v532_v51 = vld [vmem:[%s1901_s2 + $0x70] sm:$0xff]  ;;  %v741_v53 = vld [vmem:[%s1658_s24 + $0x8] sm:$0xff]  ;;  %v1121_v55 = vld [vmem:[%s1901_s2 + $0xf8] sm:$0xff] }
  0xf6   : > { %758 = vperm.xlu0 %1331, %v740_v48   ;;  %s552_s19 = sld [smem:[#allocation2 + %s551_s16]]  ;;  %1333 = vset.pattern.permute.xlu2 %v1508_v49  ;;  %v1120_v54 = vld [vmem:[%s1901_s2 + $0xf0] sm:$0xff]  ;;  %v530_v56 = vld [vmem:[%s1901_s2 + $0x60] sm:$0xff]  ;;  %v531_v57 = vld [vmem:[%s1901_s2 + $0x68] sm:$0xff] }
  0xf7   : > { %768 = vperm.xlu1 %1332, %v742_v50   ;;  %v1118_v58 = vld [vmem:[%s1901_s2 + $0xe0] sm:$0xff]  ;;  %v1119_v59 = vld [vmem:[%s1901_s2 + $0xe8] sm:$0xff]  ;;  %v528_v61 = vld [vmem:[%s1901_s2 + $0x50] sm:$0xff] }
  0xf8   : > { %v529_v62 = vld [vmem:[%s1901_s2 + $0x58] sm:$0xff]  ;;  %v1116_v63 = vld [vmem:[%s1901_s2 + $0xd0] sm:$0xff]  ;;  %v526_v18 = vld [vmem:[%s1901_s2 + $0x40] sm:$0xff] }
  0xf9   : > { %v1117_v4 = vld [vmem:[%s1901_s2 + $0xd8] sm:$0xff]  ;;  %v527_v19 = vld [vmem:[%s1901_s2 + $0x48] sm:$0xff]  ;;  %v1114_v21 = vld [vmem:[%s1901_s2 + $0xc0] sm:$0xff] }
  0xfa   : > { %v743_v9 = vld [vmem:[%s1658_s24 + $0x18] sm:$0xff]  ;;  %v1115_v22 = vld [vmem:[%s1901_s2 + $0xc8] sm:$0xff]  ;;  %v746_v24 = vld [vmem:[%s1658_s24 + $0x30] sm:$0xff] }
  0xfb   : > { %v1737_v60 = vstv %s517_s10  ;;  %v524_v29 = vld [vmem:[%s1901_s2 + $0x30] sm:$0xff]  ;;  %v525_v33 = vld [vmem:[%s1901_s2 + $0x38] sm:$0xff]  ;;  %v744_v35 = vld [vmem:[%s1658_s24 + $0x20] sm:$0xff] }
  0xfc   : > { %v549_v0 = vmul.f32 %v1737_v60, %v532_v51  ;;  %v550_v1 = vmul.f32 %v1737_v60, %v533_v52  ;;  %v1750_v2 = vstv %s552_s19  ;;  %v547_v3 = vmul.f32 %v1737_v60, %v530_v56  ;;  %v1112_v34 = vld [vmem:[%s1901_s2 + $0xb0] sm:$0xff]  ;;  %v1113_v36 = vld [vmem:[%s1901_s2 + $0xb8] sm:$0xff]  ;;  %778 = vperm.xlu2 %1333, %v744_v35   ;;  %v522_v41 = vld [vmem:[%s1901_s2 + $0x20] sm:$0xff] }
  0xfd   : > { %v585_v5 = vmul.f32 %v1120_v54, %v1750_v2  ;;  %v586_v6 = vmul.f32 %v1121_v55, %v1750_v2  ;;  %v548_v7 = vmul.f32 %v1737_v60, %v531_v57  ;;  %v583_v8 = vmul.f32 %v1118_v58, %v1750_v2  ;;  %v747_v42 = vld [vmem:[%s1658_s24 + $0x38] sm:$0xff]  ;;  %v523_v46 = vld [vmem:[%s1901_s2 + $0x28] sm:$0xff]  ;;  %v1110_v47 = vld [vmem:[%s1901_s2 + $0xa0] sm:$0xff] }
  0xfe   : > { %763 = vperm.xlu0 %1331, %v741_v53   ;;  %v584_v10 = vmul.f32 %v1119_v59, %v1750_v2  ;;  %v545_v11 = vmul.f32 %v1737_v60, %v528_v61  ;;  %v546_v12 = vmul.f32 %v1737_v60, %v529_v62  ;;  %v581_v13 = vmul.f32 %v1116_v63, %v1750_v2  ;;  %v1111_v48 = vld [vmem:[%s1901_s2 + $0xa8] sm:$0xff]  ;;  %v520_v53 = vld [vmem:[%s1901_s2 + $0x10] sm:$0xff]  ;;  %v521_v54 = vld [vmem:[%s1901_s2 + $0x18] sm:$0xff] }
  0xff   : > { %v601_v14 = vadd.f32 %v585_v5, %v549_v0  ;;  %v602_v15 = vadd.f32 %v586_v6, %v550_v1  ;;  %v599_v16 = vadd.f32 %v583_v8, %v547_v3  ;;  %v582_v17 = vmul.f32 %v1117_v4, %v1750_v2  ;;  %773 = vperm.xlu1 %1332, %v743_v9   ;;  %v745_v55 = vld [vmem:[%s1658_s24 + $0x28] sm:$0xff]  ;;  %v1108_v61 = vld [vmem:[%s1901_s2 + $0x90] sm:$0xff]  ;;  %v1109_v62 = vld [vmem:[%s1901_s2 + $0x98] sm:$0xff] }
 0x100   : > { %v600_v20 = vadd.f32 %v584_v10, %v548_v7  ;;  %v597_v25 = vadd.f32 %v581_v13, %v545_v11  ;;  %v543_v27 = vmul.f32 %v1737_v60, %v526_v18  ;;  %v544_v28 = vmul.f32 %v1737_v60, %v527_v19  ;;  %v749_v57 = vld [vmem:[%s1658_s24 + $0x48] sm:$0xff]  ;;  %v750_v6 = vld [vmem:[%s1658_s24 + $0x50] sm:$0xff]  ;;  %v518_v8 = vld [vmem:[%s1901_s2] sm:$0xff] }
 0x101   : > { %v626_v23 = vpack.c.bf16 %v602_v15, %v601_v14  ;;  %v598_v26 = vadd.f32 %v582_v17, %v546_v12  ;;  %v579_v31 = vmul.f32 %v1114_v21, %v1750_v2  ;;  %v580_v32 = vmul.f32 %v1115_v22, %v1750_v2  ;;  %v519_v9 = vld [vmem:[%s1901_s2 + $0x8] sm:$0xff]  ;;  %v1106_v10 = vld [vmem:[%s1901_s2 + $0x80] sm:$0xff] }
 0x102   : > { %v625_v30 = vpack.c.bf16 %v600_v20, %v599_v16  ;;  %v541_v38 = vmul.f32 %v1737_v60, %v524_v29  ;;  %v542_v39 = vmul.f32 %v1737_v60, %v525_v33  ;;  %v577_v40 = vmul.f32 %v1112_v34, %v1750_v2  ;;  %v1107_v11 = vld [vmem:[%s1901_s2 + $0x88] sm:$0xff]  ;;  %v752_v16 = vld [vmem:[%s1658_s24 + $0x60] sm:$0xff]  ;;  %v1167_v29 = vld [vmem:[%s1643_s15 + $0x30] sm:$0xff] }
 0x103   : > { %675 = vmatpush.bf16.msra.mxu0 %v626_v23  ;;  %1217 = vmatpush.bf16.msra.mxu1 %v626_v23  ;;  %v624_v37 = vpack.c.bf16 %v598_v26, %v597_v25  ;;  %v595_v43 = vadd.f32 %v579_v31, %v543_v27  ;;  %v596_v44 = vadd.f32 %v580_v32, %v544_v28  ;;  %v748_v20 = vld [vmem:[%s1658_s24 + $0x40] sm:$0xff]  ;;  %v753_v21 = vld [vmem:[%s1658_s24 + $0x68] sm:$0xff]  ;;  %v755_v25 = vld [vmem:[%s1658_s24 + $0x78] sm:$0xff] }
 0x104   : > { %1218 = vmatpush.bf16.msra.mxu2 %v626_v23  ;;  %1219 = vmatpush.bf16.msra.mxu3 %v626_v23  ;;  %v578_v45 = vmul.f32 %v1113_v36, %v1750_v2  ;;  %v539_v49 = vmul.f32 %v1737_v60, %v522_v41  ;;  %v540_v50 = vmul.f32 %v1737_v60, %v523_v46  ;;  %v1161_v26 = vld [vmem:[%s1643_s15] sm:$0xff]  ;;  %v1163_v27 = vld [vmem:[%s1643_s15 + $0x10] sm:$0xff]  ;;  %v1162_v31 = vld [vmem:[%s1643_s15 + $0x8] sm:$0xff] }
 0x105   : > { %v575_v51 = vmul.f32 %v1110_v47, %v1750_v2  ;;  %v576_v52 = vmul.f32 %v1111_v48, %v1750_v2  ;;  %v623_v56 = vpack.c.bf16 %v596_v44, %v595_v43  ;;  %v593_v58 = vadd.f32 %v577_v40, %v541_v38  ;;  %783 = vperm.xlu2 %1333, %v745_v55   ;;  %v1165_v28 = vld [vmem:[%s1643_s15 + $0x20] sm:$0xff]  ;;  %v1164_v32 = vld [vmem:[%s1643_s15 + $0x18] sm:$0xff]  ;;  %v1166_v33 = vld [vmem:[%s1643_s15 + $0x28] sm:$0xff] }
 0x106   : > { %788 = vperm.xlu0 %1331, %v746_v24   ;;  %v594_v59 = vadd.f32 %v578_v45, %v542_v39  ;;  %v537_v63 = vmul.f32 %v1737_v60, %v520_v53  ;;  %v538_v0 = vmul.f32 %v1737_v60, %v521_v54  ;;  %v573_v4 = vmul.f32 %v1108_v61, %v1750_v2  ;;  %v1168_v34 = vld [vmem:[%s1643_s15 + $0x38] sm:$0xff]  ;;  %v724_v45 = vld [vmem:[#allocation9] sm:$0xff] }
 0x107   : > { %676 = vmatpush.bf16.msra.mxu0 %v625_v30  ;;  %1220 = vmatpush.bf16.msra.mxu1 %v625_v30  ;;  %v591_v1 = vadd.f32 %v575_v51, %v539_v49  ;;  %v592_v3 = vadd.f32 %v576_v52, %v540_v50  ;;  %v574_v5 = vmul.f32 %v1109_v62, %v1750_v2  ;;  %v728_v47 = vld [vmem:[#allocation9 + $0x20] sm:$0xff] }
 0x108   : > { %1221 = vmatpush.bf16.msra.mxu2 %v625_v30  ;;  %1222 = vmatpush.bf16.msra.mxu3 %v625_v30  ;;  %v622_v7 = vpack.c.bf16 %v594_v59, %v593_v58  ;;  %v589_v13 = vadd.f32 %v573_v4, %v537_v63  ;;  %v535_v15 = vmul.f32 %v1737_v60, %v518_v8  ;;  %v754_v30 = vld [vmem:[%s1658_s24 + $0x70] sm:$0xff]  ;;  %v736_v58 = vld [vmem:[#allocation9 + $0x60] sm:$0xff]  ;;  %v725_v63 = vld [vmem:[#allocation9 + $0x8] sm:$0xff] }
 0x109   : > { %793 = vperm.xlu1 %1332, %v747_v42   ;;  %v621_v12 = vpack.c.bf16 %v592_v3, %v591_v1  ;;  %v590_v14 = vadd.f32 %v574_v5, %v538_v0  ;;  %v536_v17 = vmul.f32 %v1737_v60, %v519_v9  ;;  %v571_v18 = vmul.f32 %v1106_v10, %v1750_v2  ;;  %v751_v60 = vld [vmem:[%s1658_s24 + $0x58] sm:$0xff]  ;;  %v729_v1 = vld [vmem:[#allocation9 + $0x28] sm:$0xff] }
 0x10a   : > { %v572_v19 = vmul.f32 %v1107_v11, %v1750_v2 }
 0x10b   : > { %677 = vmatpush.bf16.msra.mxu0 %v624_v37  ;;  %1223 = vmatpush.bf16.msra.mxu1 %v624_v37  ;;  %v620_v22 = vpack.c.bf16 %v590_v14, %v589_v13  ;;  %v587_v23 = vadd.f32 %v571_v18, %v535_v15  ;;  %v737_v14 = vld [vmem:[#allocation9 + $0x68] sm:$0xff]  ;;  %v726_v18 = vld [vmem:[#allocation9 + $0x10] sm:$0xff] }
 0x10c   : > { %1224 = vmatpush.bf16.msra.mxu2 %v624_v37  ;;  %1225 = vmatpush.bf16.msra.mxu3 %v624_v37  ;;  %v588_v24 = vadd.f32 %v572_v19, %v536_v17 }
 0x10d   : > { %798 = vperm.xlu2 %1333, %v748_v20   ;;  %v730_v20 = vld [vmem:[#allocation9 + $0x30] sm:$0xff] }
 0x10e   : > { %803 = vperm.xlu0 %1331, %v749_v57   ;;  %v619_v2 = vpack.c.bf16 %v588_v24, %v587_v23 }
 0x10f   : > { %678 = vmatpush.bf16.msra.mxu0 %v623_v56  ;;  %1226 = vmatpush.bf16.msra.mxu1 %v623_v56 }
 0x110   : > { %1227 = vmatpush.bf16.msra.mxu2 %v623_v56  ;;  %1228 = vmatpush.bf16.msra.mxu3 %v623_v56  ;;  %v732_v56 = vld [vmem:[#allocation9 + $0x40] sm:$0xff] }
 0x111   : > { %808 = vperm.xlu1 %1332, %v750_v6  }
 0x113   : > { %679 = vmatpush.bf16.msra.mxu0 %v622_v7  ;;  %1229 = vmatpush.bf16.msra.mxu1 %v622_v7 }
 0x114   : > { %1230 = vmatpush.bf16.msra.mxu2 %v622_v7  ;;  %1231 = vmatpush.bf16.msra.mxu3 %v622_v7 }
 0x115   : > { %813 = vperm.xlu2 %1333, %v751_v60  }
 0x116   : > { %818 = vperm.xlu0 %1331, %v752_v16  }
 0x117   : > { %680 = vmatpush.bf16.msra.mxu0 %v621_v12  ;;  %1232 = vmatpush.bf16.msra.mxu1 %v621_v12 }
 0x118   : > { %1233 = vmatpush.bf16.msra.mxu2 %v621_v12  ;;  %1234 = vmatpush.bf16.msra.mxu3 %v621_v12  ;;  %v733_v12 = vld [vmem:[#allocation9 + $0x48] sm:$0xff] }
 0x119   : > { %823 = vperm.xlu1 %1332, %v753_v21  }
 0x11b   : > { %681 = vmatpush.bf16.msra.mxu0 %v620_v22  ;;  %1235 = vmatpush.bf16.msra.mxu1 %v620_v22 }
 0x11c   : > { %1236 = vmatpush.bf16.msra.mxu2 %v620_v22  ;;  %1237 = vmatpush.bf16.msra.mxu3 %v620_v22 }
 0x11d   : > { %828 = vperm.xlu2 %1333, %v754_v30  }
 0x11e   : > { %833 = vperm.xlu0 %1331, %v755_v25  }
 0x11f   : > { %682 = vmatpush.bf16.msra.mxu0 %v619_v2  ;;  %1238 = vmatpush.bf16.msra.mxu1 %v619_v2 }
 0x120   : > { %1239 = vmatpush.bf16.msra.mxu2 %v619_v2  ;;  %1240 = vmatpush.bf16.msra.mxu3 %v619_v2 }
 0x122   : > { %683 = vmatmul.bf16.vlgmr.msra.gmra.mxu0 %v1161_v26  ;;  %693 = vmatmul.bf16.vlgmr.msra.gmra.mxu1 %v1163_v27  ;;  %v734_v27 = vld [vmem:[#allocation9 + $0x50] sm:$0xff] }
 0x123   : > { %703 = vmatmul.bf16.vlgmr.msra.gmra.mxu2 %v1165_v28  ;;  %713 = vmatmul.bf16.vlgmr.msra.gmra.mxu3 %v1167_v29  ;;  %v738_v29 = vld [vmem:[#allocation9 + $0x70] sm:$0xff] }
 0x132   : > { %688 = vmatmul.bf16.gmra.mxu0 %v1162_v31  ;;  %698 = vmatmul.bf16.gmra.mxu1 %v1164_v32 }
 0x133   : > { %708 = vmatmul.bf16.gmra.mxu2 %v1166_v33  ;;  %718 = vmatmul.bf16.gmra.mxu3 %v1168_v34  ;;  %v727_v33 = vld [vmem:[#allocation9 + $0x18] sm:$0xff] }
 0x156   : > { %v779_v38 = vpop.permute.xlu2 %778 }
 0x15f   : > { %v784_v41 = vpop.permute.xlu2 %783 }
 0x167   : > { %v799_v50 = vpop.permute.xlu2 %798 }
 0x168   : > { %v759_v35 = vpop.permute.xlu0 %758 }
 0x169   : > { %v769_v36 = vpop.permute.xlu1 %768 }
 0x16f   : > { %v814_v9 = vpop.permute.xlu2 %813 }
 0x170   : > { %v764_v37 = vpop.permute.xlu0 %763 }
 0x171   : > { %v1866_v39 = vpop.permute.xlu1 %773 }
 0x177   : > { %v829_v25 = vpop.permute.xlu2 %828 }
 0x178   : > { %v789_v40 = vpop.permute.xlu0 %788 }
 0x17b   : > { %v1868_v42 = vpop.permute.xlu1 %793 }
 0x180   : > { %v804_v43 = vpop.permute.xlu0 %803 }
 0x183   : > { %v809_v53 = vpop.permute.xlu1 %808 }
 0x188   : > { %v819_v54 = vpop.permute.xlu0 %818 }
 0x18b   : > { %v824_v10 = vpop.permute.xlu1 %823 }
 0x19f   : > { %v684_v44 = vpop.f32.mrf.mxu0  ;;  %v694_v46 = vpop.f32.mrf.mxu1 }
 0x1a0   : > { %v836_v48 = vmul.f32 %v759_v35, %v684_v44  ;;  %v840_v49 = vmul.f32 %v779_v38, %v694_v46  ;;  %v731_v35 = vld [vmem:[#allocation9 + $0x38] sm:$0xff]  ;;  %v834_v44 = vpop.permute.xlu0 %833 }
 0x1a1   : > { %v735_v46 = vld [vmem:[#allocation9 + $0x58] sm:$0xff] }
 0x1a2   : > { %v852_v51 = vadd.f32 %v836_v48, %v724_v45  ;;  %v856_v52 = vadd.f32 %v840_v49, %v728_v47  ;;  %v739_v48 = vld [vmem:[#allocation9 + $0x78] sm:$0xff] }
 0x1a4   : > { %868 = vst [vmem:[#allocation9] sm:$0xff] %v852_v51 }
 0x1a5   : > { %872 = vst [vmem:[#allocation9 + $0x20] sm:$0xff] %v856_v52 }
 0x1a6   : > { %v704_v55 = vpop.f32.mrf.mxu2  ;;  %v714_v57 = vpop.f32.mrf.mxu3 }
 0x1a7   : > { %v844_v59 = vmul.f32 %v799_v50, %v704_v55  ;;  %v848_v61 = vmul.f32 %v819_v54, %v714_v57  ;;  %v686_v62 = vpop.f32.mrf.mxu0  ;;  %v696_v0 = vpop.f32.mrf.mxu1 }
 0x1a8   : > { %v837_v3 = vmul.f32 %v764_v37, %v686_v62  ;;  %v841_v4 = vmul.f32 %v784_v41, %v696_v0 }
 0x1a9   : > { %v860_v5 = vadd.f32 %v844_v59, %v732_v56  ;;  %v864_v6 = vadd.f32 %v848_v61, %v736_v58 }
 0x1aa   : > { %v853_v7 = vadd.f32 %v837_v3, %v725_v63  ;;  %v857_v8 = vadd.f32 %v841_v4, %v729_v1 }
 0x1ab   : > { %876 = vst [vmem:[#allocation9 + $0x40] sm:$0xff] %v860_v5 }
 0x1ac   : > { %880 = vst [vmem:[#allocation9 + $0x60] sm:$0xff] %v864_v6 }
 0x1ad   : > { %869 = vst [vmem:[#allocation9 + $0x8] sm:$0xff] %v853_v7 }
 0x1ae   : > { %873 = vst [vmem:[#allocation9 + $0x28] sm:$0xff] %v857_v8  ;;  %v706_v11 = vpop.f32.mrf.mxu2  ;;  %v716_v13 = vpop.f32.mrf.mxu3 }
 0x1af   : > { %v845_v15 = vmul.f32 %v804_v43, %v706_v11  ;;  %v849_v16 = vmul.f32 %v824_v10, %v716_v13  ;;  %v689_v17 = vpop.f32.mrf.mxu0  ;;  %v699_v19 = vpop.f32.mrf.mxu1 }
 0x1b0   : > { %v838_v21 = vmul.f32 %v769_v36, %v689_v17  ;;  %v842_v22 = vmul.f32 %v789_v40, %v699_v19 }
 0x1b1   : > { %v861_v23 = vadd.f32 %v845_v15, %v733_v12  ;;  %v865_v24 = vadd.f32 %v849_v16, %v737_v14 }
 0x1b2   : > { %v854_v60 = vadd.f32 %v838_v21, %v726_v18  ;;  %v858_v2 = vadd.f32 %v842_v22, %v730_v20 }
 0x1b3   : > { %877 = vst [vmem:[#allocation9 + $0x48] sm:$0xff] %v861_v23 }
 0x1b4   : > { %881 = vst [vmem:[#allocation9 + $0x68] sm:$0xff] %v865_v24 }
 0x1b5   : > { %870 = vst [vmem:[#allocation9 + $0x10] sm:$0xff] %v854_v60 }
 0x1b6   : > { %874 = vst [vmem:[#allocation9 + $0x30] sm:$0xff] %v858_v2  ;;  %v709_v26 = vpop.f32.mrf.mxu2  ;;  %v719_v28 = vpop.f32.mrf.mxu3 }
 0x1b7   : > { %v846_v30 = vmul.f32 %v809_v53, %v709_v26  ;;  %v850_v31 = vmul.f32 %v829_v25, %v719_v28  ;;  %v691_v32 = vpop.f32.mrf.mxu0  ;;  %v701_v34 = vpop.f32.mrf.mxu1 }
 0x1b8   : > { %v839_v36 = vmul.f32 %v1866_v39, %v691_v32  ;;  %v843_v37 = vmul.f32 %v1868_v42, %v701_v34 }
 0x1b9   : > { %v862_v38 = vadd.f32 %v846_v30, %v734_v27  ;;  %v866_v40 = vadd.f32 %v850_v31, %v738_v29 }
 0x1ba   : > { %v855_v41 = vadd.f32 %v839_v36, %v727_v33  ;;  %v859_v43 = vadd.f32 %v843_v37, %v731_v35 }
 0x1bb   : > { %878 = vst [vmem:[#allocation9 + $0x50] sm:$0xff] %v862_v38 }
 0x1bc   : > { %882 = vst [vmem:[#allocation9 + $0x70] sm:$0xff] %v866_v40 }
 0x1bd   : > { %871 = vst [vmem:[#allocation9 + $0x18] sm:$0xff] %v855_v41 }
 0x1be   : > { %875 = vst [vmem:[#allocation9 + $0x38] sm:$0xff] %v859_v43  ;;  %v711_v45 = vpop.f32.mrf.mxu2  ;;  %v721_v47 = vpop.f32.mrf.mxu3 }
 0x1bf   : > { %v847_v49 = vmul.f32 %v814_v9, %v711_v45  ;;  %v851_v50 = vmul.f32 %v834_v44, %v721_v47 }
 0x1c0   : > { %887 = sbr.rel (%p1154_p3) target bundleno = 475 (0x1db), region = 68 }
 0x1c1   : > { %v863_v51 = vadd.f32 %v847_v49, %v735_v46  ;;  %v867_v52 = vadd.f32 %v851_v50, %v739_v48 }
 0x1c3   : > { %879 = vst [vmem:[#allocation9 + $0x58] sm:$0xff] %v863_v51 }
 0x1c4   : > { %883 = vst [vmem:[#allocation9 + $0x78] sm:$0xff] %v867_v52 }
 0x1c5   : > { %v888_v39 = vld [vmem:[#allocation9] sm:$0xff]  ;;  %v889_v53 = vld [vmem:[#allocation9 + $0x8] sm:$0xff]  ;;  %v890_v54 = vld [vmem:[#allocation9 + $0x10] sm:$0xff] }
 0x1c6   : > { %v1334_v42 = vld [vmem:[%s1905_s6] ss:$0 sm:$0xff]  ;;  %v891_v55 = vld [vmem:[#allocation9 + $0x18] sm:$0xff]  ;;  %v893_v62 = vld [vmem:[#allocation9 + $0x28] sm:$0xff] }
 0x1c7   : > { %v908_v56 = vadd.f32 %v1334_v42, %v888_v39  ;;  %v909_v57 = vadd.f32 %v1334_v42, %v889_v53  ;;  %v910_v58 = vadd.f32 %v1334_v42, %v890_v54  ;;  %v911_v59 = vadd.f32 %v1334_v42, %v891_v55  ;;  %v892_v61 = vld [vmem:[#allocation9 + $0x20] sm:$0xff]  ;;  %v894_v63 = vld [vmem:[#allocation9 + $0x30] sm:$0xff]  ;;  %v895_v3 = vld [vmem:[#allocation9 + $0x38] sm:$0xff] }
 0x1c8   : > { %v912_v0 = vadd.f32 %v1334_v42, %v892_v61  ;;  %v913_v1 = vadd.f32 %v1334_v42, %v893_v62  ;;  %v896_v4 = vld [vmem:[#allocation9 + $0x40] sm:$0xff]  ;;  %v914_v8 = vadd.f32 %v1334_v42, %v894_v63  ;;  %v897_v9 = vld [vmem:[#allocation9 + $0x48] sm:$0xff]  ;;  %v915_v11 = vadd.f32 %v1334_v42, %v895_v3  ;;  %v898_v12 = vld [vmem:[#allocation9 + $0x50] sm:$0xff] }
 0x1c9   : > { %v924_v5 = vmax.f32 %v908_v56, 0.0  ;;  %v925_v6 = vmax.f32 %v909_v57, 0.0  ;;  %v926_v7 = vmax.f32 %v910_v58, 0.0  ;;  %v927_v10 = vmax.f32 %v911_v59, 0.0  ;;  %v900_v18 = vld [vmem:[#allocation9 + $0x60] sm:$0xff]  ;;  %v901_v21 = vld [vmem:[#allocation9 + $0x68] sm:$0xff] }
 0x1ca   : > { %v928_v13 = vmax.f32 %v912_v0, 0.0  ;;  %v916_v14 = vadd.f32 %v1334_v42, %v896_v4  ;;  %v899_v15 = vld [vmem:[#allocation9 + $0x58] sm:$0xff]  ;;  %v929_v16 = vmax.f32 %v913_v1, 0.0  ;;  %v917_v17 = vadd.f32 %v1334_v42, %v897_v9  ;;  %v902_v24 = vld [vmem:[#allocation9 + $0x70] sm:$0xff] }
 0x1cb   : > { %940 = vst [vmem:[#allocation9] sm:$0xff] %v924_v5  ;;  %v930_v19 = vmax.f32 %v914_v8, 0.0  ;;  %v918_v20 = vadd.f32 %v1334_v42, %v898_v12  ;;  %v931_v22 = vmax.f32 %v915_v11, 0.0  ;;  %v919_v23 = vadd.f32 %v1334_v42, %v899_v15  ;;  %v903_v25 = vld [vmem:[#allocation9 + $0x78] sm:$0xff] }
 0x1cc   : > { %941 = vst [vmem:[#allocation9 + $0x8] sm:$0xff] %v925_v6  ;;  %v932_v60 = vmax.f32 %v916_v14, 0.0  ;;  %v920_v2 = vadd.f32 %v1334_v42, %v900_v18  ;;  %v933_v26 = vmax.f32 %v917_v17, 0.0  ;;  %v921_v27 = vadd.f32 %v1334_v42, %v901_v21 }
 0x1cd   : > { %942 = vst [vmem:[#allocation9 + $0x10] sm:$0xff] %v926_v7  ;;  %v934_v28 = vmax.f32 %v918_v20, 0.0  ;;  %v922_v29 = vadd.f32 %v1334_v42, %v902_v24  ;;  %v935_v30 = vmax.f32 %v919_v23, 0.0  ;;  %v923_v31 = vadd.f32 %v1334_v42, %v903_v25 }
 0x1ce   : > { %943 = vst [vmem:[#allocation9 + $0x18] sm:$0xff] %v927_v10  ;;  %v936_v32 = vmax.f32 %v920_v2, 0.0  ;;  %v937_v33 = vmax.f32 %v921_v27, 0.0 }
 0x1cf   : > { %944 = vst [vmem:[#allocation9 + $0x20] sm:$0xff] %v928_v13  ;;  %v938_v34 = vmax.f32 %v922_v29, 0.0  ;;  %v939_v35 = vmax.f32 %v923_v31, 0.0 }
 0x1d0   : > { %945 = vst [vmem:[#allocation9 + $0x28] sm:$0xff] %v929_v16 }
 0x1d1   : > { %946 = vst [vmem:[#allocation9 + $0x30] sm:$0xff] %v930_v19 }
 0x1d2   : > { %947 = vst [vmem:[#allocation9 + $0x38] sm:$0xff] %v931_v22 }
 0x1d3   : > { %948 = vst [vmem:[#allocation9 + $0x40] sm:$0xff] %v932_v60 }
 0x1d4   : > { %949 = vst [vmem:[#allocation9 + $0x48] sm:$0xff] %v933_v26 }
 0x1d5   : > { %950 = vst [vmem:[#allocation9 + $0x50] sm:$0xff] %v934_v28 }
 0x1d6   : > { %951 = vst [vmem:[#allocation9 + $0x58] sm:$0xff] %v935_v30 }
 0x1d7   : > { %952 = vst [vmem:[#allocation9 + $0x60] sm:$0xff] %v936_v32 }
 0x1d8   : > { %953 = vst [vmem:[#allocation9 + $0x68] sm:$0xff] %v937_v33 }
 0x1d9   : > { %954 = vst [vmem:[#allocation9 + $0x70] sm:$0xff] %v938_v34 }
 0x1da   : > { %955 = vst [vmem:[#allocation9 + $0x78] sm:$0xff] %v939_v35 }
 0x1db PF: > { %s1917_s27 = sadd.s32 4294967295, %s1500_s29   ;;  %s966_s23 = sshll.u32 %s1906_s7, 4  ;;  %s967_s23 = int_to_ptr.hbm [resolvable:$true] %s966_s23 }
 0x1dc   : > { %p1271_p4 = scmp.eq.s32.totalorder %s1917_s27, 2  ;;  %s1509_s30 = smov [#allocation9]  }
 0x1dd   : > { %s964_s8 = sshll.u32 %s1509_s30, 4  ;;  %s1510_s12 = smov 128   ;;  %s965_s8 = int_to_ptr.vmem [resolvable:$true] %s964_s8 }
 0x1de   : > { %s1511_s10 = smov 8  }
 0x1df   : > { %1252 = dma.vmem_to_hbm [thread:$0]  (%p1271_p4), %s965_s8, 2048, %s967_s23, [#allocation4], %s1510_s12, %s1510_s12, %s1511_s10  }
 0x1e0   : > { %1475 = dma.done.wait (%p1271_p4), [#allocation4], 2048  }
 0x1e1   : > { %1477 = vsyncadd (%p1271_p4), [#allocation4], 4294965248 }
 0x1e2 PF: > { %s23_s29 = sadd.s32 1, %s1500_s29   ;;  %s1918_s24 = smov %s1484_s25 }
 0x1e3   : > { %p20_p5 = scmp.ge.s32.totalorder %s23_s29, 5   ;;  %s1919_s25 = smov %s1488_s26 }
 0x1e4   : > { %s1920_s26 = smov %s1632_s20  ;;  %s1921_s27 = smov %s1496_s28 }
 0x1e5   : > { %s1922_s28 = smov %s1924_s11  ;;  %22 = sbr.rel (!%p20_p5) target bundleno = 10 (0xa), region = 110 }
 0x1ea   :  { %983 = vsyncpa [#allocation3], 1 }
 0x1eb   :  { %985 = vsyncpa [#allocation3 + $0x1], 1 }
 0x1ec   :  { %986 = vsyncpa [#allocation8], 1 }
 0x1ed   :  { %987 = vsyncpa [#allocation4], 1 }
 0x1ee   :  { %989 = vsyncpa [#allocation4 + $0x1], 1 }
 0x1ef   :  { %990 = vsyncpa [#allocation5], 1 }
 0x1f0   :  { %992 = vsyncpa [#allocation5 + $0x1], 1 }

</bundles_post_ra>
